<compile_context>
chip_gen: v5e
topology: v5e:2x2
jax: 0.10.0
libtpu: 0.0.40
codegen_flags: <defaults>
</compile_context>

<pallas_src>
import functools
import math

import jax
import jax.numpy as jnp
from jax import lax
from jax.experimental import pallas as pl
from jax.experimental.pallas import tpu as pltpu

BN_EPS = 1e-5
GEM_EPS = 1e-6
NUM_GROUPS = 1
WIDTH_PER_GROUP = 64
_IN_STAGE_DS = {50: (3, 4, 6, 3), 101: (3, 4, 23, 3), 152: (3, 8, 36, 3)}


def _round_up(x, m):
    return (x + m - 1) // m * m


# ---------------------------------------------------------------------------
# Tiled fused GEMM kernel (conv-as-matmul + folded-BN bias + ReLU + residual).
# ---------------------------------------------------------------------------
def _make_mm_kernel(relu, has_residual):
    def kernel(*refs):
        if has_residual:
            x_ref, w_ref, b_ref, r_ref, o_ref, acc_ref = refs
        else:
            x_ref, w_ref, b_ref, o_ref, acc_ref = refs

        k = pl.program_id(2)

        @pl.when(k == 0)
        def _():
            acc_ref[...] = jnp.zeros_like(acc_ref)

        # bf16 x bf16 -> f32 accumulation on the MXU.
        acc_ref[...] += jnp.dot(x_ref[...], w_ref[...],
                                preferred_element_type=jnp.float32)

        @pl.when(k == pl.num_programs(2) - 1)
        def _():
            y = acc_ref[...] + b_ref[...]                 # f32 epilogue
            if has_residual:
                y = y + r_ref[...].astype(jnp.float32)
            if relu:
                y = jnp.maximum(y, 0.0)
            o_ref[...] = y.astype(o_ref.dtype)

    return kernel


@functools.partial(jax.jit, static_argnames=("relu", "out_dtype"))
def _fused_matmul(x, w, bias, residual=None, *, relu, out_dtype=jnp.bfloat16):
    """y = act((x @ w) + bias [+ residual]);  x:(M,K) bf16, w:(K,N) bf16."""
    M, K = x.shape
    N = w.shape[1]

    # Tile selection: lane-dense N (multiple of 128), f32 acc scratch in VMEM.
    # Working set stays ~2 MiB, well under the scoped-VMEM default on
    # v5e/v6e/v7x (no vmem_limit_bytes override needed).
    tm = _round_up(M, 8) if M < 256 else 256
    Mp = _round_up(M, tm)
    Np = _round_up(N, 128)
    tn = 256 if Np % 256 == 0 else 128
    Kp = _round_up(K, 128)
    tk = 512 if Kp % 512 == 0 else (256 if Kp % 256 == 0 else 128)

    if (Mp, Kp) != (M, K):
        x = jnp.pad(x, ((0, Mp - M), (0, Kp - K)))
    if (Kp, Np) != (K, N):
        w = jnp.pad(w, ((0, Kp - K), (0, Np - N)))
    bias2 = bias.reshape(1, N).astype(jnp.float32)
    if Np != N:
        bias2 = jnp.pad(bias2, ((0, 0), (0, Np - N)))

    inputs = [x, w, bias2]
    in_specs = [
        pl.BlockSpec((tm, tk), lambda i, j, k: (i, k)),
        pl.BlockSpec((tk, tn), lambda i, j, k: (k, j)),
        pl.BlockSpec((1, tn), lambda i, j, k: (0, j)),
    ]
    has_residual = residual is not None
    if has_residual:
        if residual.shape != (Mp, Np):
            residual = jnp.pad(residual, ((0, Mp - M), (0, Np - N)))
        inputs.append(residual)
        in_specs.append(pl.BlockSpec((tm, tn), lambda i, j, k: (i, j)))

    out_bytes = jnp.dtype(out_dtype).itemsize
    cost = pl.CostEstimate(
        flops=2 * Mp * Np * Kp,
        transcendentals=0,
        bytes_accessed=(Mp * Kp * 2 + Kp * Np * 2 + Mp * Np * out_bytes
                        + Np * 4 + (Mp * Np * 2 if has_residual else 0)),
    )

    out = pl.pallas_call(
        _make_mm_kernel(relu, has_residual),
        grid=(Mp // tm, Np // tn, Kp // tk),
        in_specs=in_specs,
        out_specs=pl.BlockSpec((tm, tn), lambda i, j, k: (i, j)),
        out_shape=jax.ShapeDtypeStruct((Mp, Np), out_dtype),
        scratch_shapes=[pltpu.VMEM((tm, tn), jnp.float32)],
        compiler_params=pltpu.CompilerParams(
            dimension_semantics=("parallel", "parallel", "arbitrary")),
        cost_estimate=cost,
    )(*inputs)

    if (Mp, Np) != (M, N):
        out = out[:M, :N]
    return out


# ---------------------------------------------------------------------------
# GeM pooling kernel (tiled over channels, math in f32).
# ---------------------------------------------------------------------------
def _gem_kernel(p_ref, x_ref, o_ref):
    # x_ref: (N, H*W, tc).  GeM: mean_{hw}(clamp(x, eps)^p) ^ (1/p)
    p = p_ref[0]
    x = jnp.maximum(x_ref[...].astype(jnp.float32), GEM_EPS)
    xp = jnp.exp(jnp.log(x) * p)
    m = jnp.mean(xp, axis=1)
    o_ref[...] = jnp.exp(jnp.log(m) * (1.0 / p)).astype(o_ref.dtype)


@jax.jit
def _gem_pool(x_nhwc, p):
    """GeneralizedMeanPoolingP to 1x1: (N,H,W,C) -> (N,C) f32."""
    N, H, W, C = x_nhwc.shape
    x3 = x_nhwc.reshape(N, H * W, C)
    tc = 512 if C % 512 == 0 else (128 if C % 128 == 0 else C)
    return pl.pallas_call(
        _gem_kernel,
        grid=(C // tc,),
        in_specs=[
            pl.BlockSpec(memory_space=pltpu.MemorySpace.SMEM),       # scalar p
            pl.BlockSpec((N, H * W, tc), lambda c: (0, 0, c)),
        ],
        out_specs=pl.BlockSpec((N, tc), lambda c: (0, c)),
        out_shape=jax.ShapeDtypeStruct((N, C), jnp.float32),
        compiler_params=pltpu.CompilerParams(
            dimension_semantics=("parallel",)),
    )(p.reshape(1).astype(jnp.float32), x3)


# ---------------------------------------------------------------------------
# Glue: im2col patch extraction, stem max-pool, block/stage wiring.
# ---------------------------------------------------------------------------
def _im2col(x, kh, kw, stride, pad):
    N, H, W, C = x.shape
    if pad > 0:
        x = jnp.pad(x, ((0, 0), (pad, pad), (pad, pad), (0, 0)))
    Ho = (H + 2 * pad - kh) // stride + 1
    Wo = (W + 2 * pad - kw) // stride + 1
    cols = []
    for i in range(kh):
        for j in range(kw):
            cols.append(x[:, i:i + stride * Ho:stride, j:j + stride * Wo:stride, :])
    patches = jnp.concatenate(cols, axis=-1)  # (N, Ho, Wo, kh*kw*C)
    return patches.reshape(N * Ho * Wo, kh * kw * C), Ho, Wo


def conv_bn(x, p, stride, pad, relu, residual=None):
    """x: NHWC bf16. p: {'wmat': (K,Cout) bf16 with BN scale folded, 'bias',
    'k', 'cin'}.  Residual (if given) is the bf16 skip activation (N,Ho,Wo,Cout)."""
    k = p["k"]
    cin = p["cin"]
    N = x.shape[0]
    if k == 1 and pad == 0:
        xs = x if stride == 1 else x[:, ::stride, ::stride, :]
        Ho, Wo = xs.shape[1], xs.shape[2]
        cols = xs.reshape(N * Ho * Wo, cin)
    else:
        # TODO(synk): 3x3/7x7 convs still materialize an im2col copy in HBM
        # (bf16 halves it); a direct halo-DMA conv kernel would remove it.
        cols, Ho, Wo = _im2col(x, k, k, stride, pad)
    cols = cols.astype(jnp.bfloat16)
    wmat = p["wmat"]
    cout = wmat.shape[1]
    if residual is not None:
        res_flat = residual.reshape(N * Ho * Wo, cout).astype(jnp.bfloat16)
        y = _fused_matmul(cols, wmat, p["bias"], res_flat,
                          relu=True, out_dtype=jnp.bfloat16)
    else:
        y = _fused_matmul(cols, wmat, p["bias"], None,
                          relu=relu, out_dtype=jnp.bfloat16)
    return y.reshape(N, Ho, Wo, cout)


def _maxpool_3x3_s2(x):
    # TODO(synk): stem 3x3/stride-2 max-pool stays as plain-JAX lax.reduce_window glue.
    return lax.reduce_window(
        x, jnp.array(-jnp.inf, x.dtype), lax.max,
        window_dimensions=(1, 3, 3, 1),
        window_strides=(1, 2, 2, 1),
        padding=((0, 0), (1, 1), (1, 1), (0, 0)))


def _bottleneck_block(x, blk):
    """ResBlock with BottleneckTransform (STRIDE_1X1=False -> stride on the 3x3)."""
    stride = blk["stride"]
    if blk["proj"] is not None:
        residual = conv_bn(x, blk["proj"], stride=stride, pad=0, relu=False)
    else:
        residual = x
    y = conv_bn(x, blk["a"], stride=1, pad=0, relu=True)
    y = conv_bn(y, blk["b"], stride=stride, pad=1, relu=True)
    # relu(BN(conv_c(y)) + residual) fused inside a single Pallas GEMM epilogue.
    y = conv_bn(y, blk["c"], stride=1, pad=0, relu=False, residual=residual)
    return y


def resnet_forward(params, x_nchw):
    x = jnp.transpose(x_nchw, (0, 2, 3, 1)).astype(jnp.bfloat16)   # NCHW -> NHWC bf16
    x = conv_bn(x, params["stem"], stride=2, pad=3, relu=True)     # ResStemIN
    x = _maxpool_3x3_s2(x)
    for blk in params["s1"]:
        x = _bottleneck_block(x, blk)
    for blk in params["s2"]:
        x = _bottleneck_block(x, blk)
    for blk in params["s3"]:
        x = _bottleneck_block(x, blk)
    x3 = x
    for blk in params["s4"]:
        x = _bottleneck_block(x, blk)
    pooled = _gem_pool(x, params["head"]["p"])                     # (N, 2048) f32
    out = _fused_matmul(pooled.astype(jnp.bfloat16),
                        params["head"]["fc_w"].astype(jnp.bfloat16),
                        params["head"]["fc_b"], None,
                        relu=False, out_dtype=jnp.float32)         # Linear(2048, nc)
    x3_nchw = jnp.transpose(x3.astype(jnp.float32), (0, 3, 1, 2))  # back to NCHW
    return out, x3_nchw


# ---------------------------------------------------------------------------
# Deterministic parameter initialization (synthetic; no checkpoint loading).
# ---------------------------------------------------------------------------
class _KeyGen:
    def __init__(self, seed):
        self._base = jax.random.PRNGKey(seed)
        self._i = 0

    def __call__(self):
        self._i += 1
        return jax.random.fold_in(self._base, self._i)


def _make_conv_bn(kg, cin, cout, k):
    fan_in = cin * k * k
    w = jax.random.normal(kg(), (cout, cin, k, k), jnp.float32) * math.sqrt(2.0 / fan_in)
    gamma = 0.9 + 0.2 * jax.random.uniform(kg(), (cout,), jnp.float32)
    beta = 0.05 * jax.random.normal(kg(), (cout,), jnp.float32)
    run_mean = 0.05 * jax.random.normal(kg(), (cout,), jnp.float32)
    run_var = 0.9 + 0.2 * jax.random.uniform(kg(), (cout,), jnp.float32)
    # Inference-mode BatchNorm folded into the conv weights (scale) + a bias.
    scale = gamma / jnp.sqrt(run_var + BN_EPS)
    bias = beta - run_mean * scale
    # Pre-reshape to im2col GEMM layout (kh*kw*Cin, Cout), fold scale, cast bf16.
    wmat = jnp.transpose(w, (2, 3, 1, 0)).reshape(k * k * cin, cout) * scale[None, :]
    return {"wmat": wmat.astype(jnp.bfloat16), "bias": bias, "k": k, "cin": cin}


def _make_block(kg, w_in, w_out, stride, w_b):
    blk = {"stride": stride}
    blk["proj"] = _make_conv_bn(kg, w_in, w_out, 1) if (w_in != w_out or stride != 1) else None
    blk["a"] = _make_conv_bn(kg, w_in, w_b, 1)
    blk["b"] = _make_conv_bn(kg, w_b, w_b, 3)
    blk["c"] = _make_conv_bn(kg, w_b, w_out, 1)
    return blk


def _make_stage(kg, w_in, w_out, stride, d, w_b):
    blocks = []
    for i in range(d):
        b_stride = stride if i == 0 else 1
        b_w_in = w_in if i == 0 else w_out
        blocks.append(_make_block(kg, b_w_in, w_out, b_stride, w_b))
    return blocks


def init_resnet_params(resnet_depth=50, reduction_dim=128, seed=0):
    kg = _KeyGen(seed)
    d1, d2, d3, d4 = _IN_STAGE_DS[resnet_depth]
    w_b = WIDTH_PER_GROUP * NUM_GROUPS
    params = {
        "stem": _make_conv_bn(kg, 3, 64, 7),
        "s1": _make_stage(kg, 64, 256, 1, d1, w_b),
        "s2": _make_stage(kg, 256, 512, 2, d2, w_b * 2),
        "s3": _make_stage(kg, 512, 1024, 2, d3, w_b * 4),
        "s4": _make_stage(kg, 1024, 2048, 2, d4, w_b * 8),
    }
    bound = 1.0 / math.sqrt(2048.0)   # PyTorch Linear default init bound
    params["head"] = {
        "p": jnp.asarray(3.0, jnp.float32),   # trainable GeM power (GeneralizedMeanPoolingP)
        "fc_w": jax.random.uniform(kg(), (2048, reduction_dim), jnp.float32, -bound, bound),
        "fc_b": jax.random.uniform(kg(), (reduction_dim,), jnp.float32, -bound, bound),
    }
    return params


if __name__ == "__main__":
    RESNET_DEPTH = 50
    REDUCTION_DIM = 128
    params = init_resnet_params(RESNET_DEPTH, REDUCTION_DIM, seed=0)

    x = jax.random.normal(jax.random.PRNGKey(0), (2, 3, 32, 32), jnp.float32)  # NCHW
    out, x3 = resnet_forward(params, x)
    out, x3 = jax.block_until_ready((out, x3))

    assert out.shape == (2, REDUCTION_DIM), out.shape
    assert x3.shape == (2, 1024, 2, 2), x3.shape
    assert bool(jnp.all(jnp.isfinite(out))) and bool(jnp.all(jnp.isfinite(x3)))
    print("KERNEL_OK")
</pallas_src>

<mosaic_0001>
module attributes {stable_mosaic.version = 11 : i64} {
  func.func @kernel(%arg0: i32, %arg1: i32, %arg2: i32, %arg3: memref<256x256xbf16, #tpu.memory_space<vmem>>, %arg4: memref<256x128xbf16, #tpu.memory_space<vmem>>, %arg5: memref<1x128xf32, #tpu.memory_space<vmem>>, %arg6: memref<256x128xbf16, #tpu.memory_space<vmem>>, %arg7: memref<256x128xf32, #tpu.memory_space<vmem>>) attributes {dimension_semantics = [#tpu.dimension_semantics<parallel>, #tpu.dimension_semantics<parallel>, #tpu.dimension_semantics<arbitrary>], iteration_bounds = array<i64: 2, 1, 1>, scalar_prefetch = 0 : i64, scratch_operands = 1 : i64, tpu.core_type = #tpu.core_type<tc>, window_params = [{transform_indices = @transform_0, window_bounds = array<i64: 256, 256>}, {transform_indices = @transform_1, window_bounds = array<i64: 256, 128>}, {transform_indices = @transform_2, window_bounds = array<i64: 1, 128>}, {transform_indices = @transform_3, window_bounds = array<i64: 256, 128>}]} {
    %c0_i32 = arith.constant 0 : i32
    %0 = arith.cmpi eq, %arg2, %c0_i32 : i32
    %1 = arith.extui %0 : i1 to i32
    %c0_i32_0 = arith.constant 0 : i32
    %2 = arith.cmpi ne, %1, %c0_i32_0 : i32
    scf.if %2 {
      %cst_10 = arith.constant 0.000000e+00 : f32
      %12 = vector.broadcast %cst_10 : f32 to vector<256x128xf32>
      %c0_11 = arith.constant 0 : index
      %c0_12 = arith.constant 0 : index
      %13 = vector.load %arg7[%c0_11, %c0_12] : memref<256x128xf32, #tpu.memory_space<vmem>>, vector<256x128xf32>
      tpu.vector_store %arg7[%c0_11, %c0_12], %12 {strides = array<i32>} : memref<256x128xf32, #tpu.memory_space<vmem>>, vector<256x128xf32>,
    } else {
    }
    %c0 = arith.constant 0 : index
    %c0_1 = arith.constant 0 : index
    %3 = vector.load %arg7[%c0, %c0_1] : memref<256x128xf32, #tpu.memory_space<vmem>>, vector<256x128xf32>
    %c0_2 = arith.constant 0 : index
    %c0_3 = arith.constant 0 : index
    %4 = vector.load %arg3[%c0_2, %c0_3] : memref<256x256xbf16, #tpu.memory_space<vmem>>, vector<256x256xbf16>
    %c0_4 = arith.constant 0 : index
    %c0_5 = arith.constant 0 : index
    %5 = vector.load %arg4[%c0_4, %c0_5] : memref<256x128xbf16, #tpu.memory_space<vmem>>, vector<256x128xbf16>
    %cst = arith.constant dense<0.000000e+00> : vector<256x128xf32>
    %6 = tpu.matmul %4, %5, %cst {dimension_numbers = #tpu.dot_dimension_numbers<[1], [0], [0], [1], [0, 0, 1, 1], [], []>} : vector<256x256xbf16>, vector<256x128xbf16>, vector<256x128xf32> -> vector<256x128xf32>
    %7 = arith.addf %3, %6 : vector<256x128xf32>
    %c0_6 = arith.constant 0 : index
    %c0_7 = arith.constant 0 : index
    %8 = vector.load %arg7[%c0_6, %c0_7] : memref<256x128xf32, #tpu.memory_space<vmem>>, vector<256x128xf32>
    tpu.vector_store %arg7[%c0_6, %c0_7], %7 {strides = array<i32>} : memref<256x128xf32, #tpu.memory_space<vmem>>, vector<256x128xf32>,
    %c0_i32_8 = arith.constant 0 : i32
    %9 = arith.cmpi eq, %arg2, %c0_i32_8 : i32
    %10 = arith.extui %9 : i1 to i32
    %c0_i32_9 = arith.constant 0 : i32
    %11 = arith.cmpi ne, %10, %c0_i32_9 : i32
    scf.if %11 {
      %c0_10 = arith.constant 0 : index
      %c0_11 = arith.constant 0 : index
      %12 = vector.load %arg7[%c0_10, %c0_11] : memref<256x128xf32, #tpu.memory_space<vmem>>, vector<256x128xf32>
      %c0_12 = arith.constant 0 : index
      %c0_13 = arith.constant 0 : index
      %13 = vector.load %arg5[%c0_12, %c0_13] : memref<1x128xf32, #tpu.memory_space<vmem>>, vector<1x128xf32>
      %14 = vector.broadcast %13 : vector<1x128xf32> to vector<256x128xf32>
      %15 = arith.addf %12, %14 : vector<256x128xf32>
      %cst_14 = arith.constant 0.000000e+00 : f32
      %16 = vector.broadcast %cst_14 : f32 to vector<256x128xf32>
      %17 = arith.maximumf %15, %16 : vector<256x128xf32>
      %18 = arith.truncf %17 : vector<256x128xf32> to vector<256x128xbf16>
      %c0_15 = arith.constant 0 : index
      %c0_16 = arith.constant 0 : index
      %19 = vector.load %arg6[%c0_15, %c0_16] : memref<256x128xbf16, #tpu.memory_space<vmem>>, vector<256x128xbf16>
      tpu.vector_store %arg6[%c0_15, %c0_16], %18 {strides = array<i32>} : memref<256x128xbf16, #tpu.memory_space<vmem>>, vector<256x128xbf16>,
    } else {
    }
    return
  }
  func.func @transform_0(%arg0: i32, %arg1: i32, %arg2: i32) -> (i32, i32) {
    %c0_i32 = arith.constant 0 : i32
    return %arg0, %arg2 : i32, i32
  }
  func.func @transform_1(%arg0: i32, %arg1: i32, %arg2: i32) -> (i32, i32) {
    %c0_i32 = arith.constant 0 : i32
    return %arg2, %arg1 : i32, i32
  }
  func.func @transform_2(%arg0: i32, %arg1: i32, %arg2: i32) -> (i32, i32) {
    %c0_i32 = arith.constant 0 : i32
    %c0_i32_0 = arith.constant 0 : i32
    return %c0_i32, %arg1 : i32, i32
  }
  func.func @transform_3(%arg0: i32, %arg1: i32, %arg2: i32) -> (i32, i32) {
    %c0_i32 = arith.constant 0 : i32
    return %arg0, %arg1 : i32, i32
  }
}

</mosaic_0001>

<bundles_post_ra>
// kernel: _fused_matmul.1
= control target key start
LH: loop header
LB: loop body
LE: loop exit
PB: predicated region body
PF: predicated region fallthrough
CT: control target
= control target key end

     0   :  { %s1613_s12 = smov 0   ;;  %s1615_s13 = smov 0   ;;  %s1822_s0 = inlined_call_operand.vmem [shape: bf16[512,256], index: 0, kind: input, shape index: {}]   ;;  %s1823_s1 = inlined_call_operand.vmem [shape: bf16[256,128], index: 1, kind: input, shape index: {}]   ;;  %s1824_s2 = inlined_call_operand.vmem [shape: f32[1,128], index: 2, kind: input, shape index: {}]   ;;  %s1825_s3 = inlined_call_operand.vmem [shape: bf16[512,128], index: 3, kind: output, shape index: {}]  }
   0x1   :  { %s1617_s14 = smov 0  }
   0x2 LB: > { %s32_s15 = sadd.s32 1, %s1587_s13  ;;  %p1184_p0 = scmp.ge.s32.totalorder %s1591_s14, 1  ;;  %s1591_s14 = sphi %s1617_s14, %s13_s14   ;;  %s1587_s13 = sphi %s1615_s13, %s1827_s13   ;;  %s1583_s12 = sphi %s1613_s12, %s1826_s12  }
   0x3   : > { %p34_p1 = scmp.ge.s32.totalorder %s32_s15, 2  ;;  %p191_p2 = scmp.lt.s32.totalorder %s1591_s14, 3 }
   0x5   : > { %s1829_s15 = smov (%p34_p1, %s32_s15), 0  ;;  %p192_p3 = pnand %p1184_p0, %p191_p2 }
   0x6   : > { %s1185_s28 = sshll.u32 (!%p192_p3), %s1583_s12, 5 }
   0x7   : > { %195 = sbr.rel (%p192_p3) target bundleno = 306 (0x132), region = 32  ;;  %p236_p4 = scmp.lt.s32.totalorder (!%p192_p3), %s1185_s28, 63 }
   0xc   : > { %v1424_v0 = vld [vmem:[%s1823_s1 + $0x38] sm:$0xff]  ;;  %v1423_v2 = vld [vmem:[%s1823_s1 + $0x30] sm:$0xff]  ;;  %v1422_v4 = vld [vmem:[%s1823_s1 + $0x28] sm:$0xff]  ;;  %s1831_s28 = smov (!%p236_p4, %s1185_s28), 63 }
   0xd   : > { %v1432_v1 = vld [vmem:[%s1823_s1 + $0x78] sm:$0xff]  ;;  %655 = vmatpush.bf16.msra.mxu0 %v1424_v0  ;;  %1528 = vmatpush.bf16.msra.mxu2 %v1424_v0  ;;  %v1431_v3 = vld [vmem:[%s1823_s1 + $0x70] sm:$0xff]  ;;  %v1430_v5 = vld [vmem:[%s1823_s1 + $0x68] sm:$0xff]  ;;  %s1384_s17 = sshll.u32 %s1831_s28, 3  ;;  %s1189_s5 = sshll.u32 %s1831_s28, 2 }
   0xe   : > { %744 = vmatpush.bf16.msra.mxu1 %v1432_v1  ;;  %1536 = vmatpush.bf16.msra.mxu3 %v1432_v1  ;;  %v1421_v6 = vld [vmem:[%s1823_s1 + $0x20] sm:$0xff]  ;;  %v1420_v8 = vld [vmem:[%s1823_s1 + $0x18] sm:$0xff]  ;;  %v1419_v10 = vld [vmem:[%s1823_s1 + $0x10] sm:$0xff]  ;;  %s1679_s22 = scalar_lea.vmem %s1822_s0, %s1384_s17  ;;  %s1765_s8 = scalar_lea.vmem %s1825_s3, %s1189_s5 }
   0xf   : > { %v1429_v7 = vld [vmem:[%s1823_s1 + $0x60] sm:$0xff]  ;;  %v1428_v9 = vld [vmem:[%s1823_s1 + $0x58] sm:$0xff]  ;;  %v1427_v11 = vld [vmem:[%s1823_s1 + $0x50] sm:$0xff] }
  0x10   : > { %v1418_v12 = vld [vmem:[%s1823_s1 + $0x8] sm:$0xff]  ;;  %v1417_v14 = vld [vmem:[%s1823_s1] sm:$0xff]  ;;  %v1200_v28 = vld [vmem:[%s1679_s22 + $0x10] sm:$0xf] }
  0x11   : > { %656 = vmatpush.bf16.msra.mxu0 %v1423_v2  ;;  %1529 = vmatpush.bf16.msra.mxu2 %v1423_v2  ;;  %v1426_v13 = vld [vmem:[%s1823_s1 + $0x48] sm:$0xff]  ;;  %v1425_v15 = vld [vmem:[%s1823_s1 + $0x40] sm:$0xff]  ;;  %v1388_v29 = vld [vmem:[%s1679_s22 + $0x14] sm:$0xf0] }
  0x12   : > { %745 = vmatpush.bf16.msra.mxu1 %v1431_v3  ;;  %1537 = vmatpush.bf16.msra.mxu3 %v1431_v3  ;;  %v1192_v16 = vld [vmem:[%s1679_s22] sm:$0xf]  ;;  %v1386_v17 = vld [vmem:[%s1679_s22 + $0x4] sm:$0xf0]  ;;  %v1385_v20 = vld [vmem:[%s1679_s22 + $0x4] sm:$0xf]  ;;  %v1201_v36 = vor.u32 %v1388_v29, %v1200_v28 }
  0x13   : > { %v1256_v18 = vld [vmem:[%s1679_s22 + $0x80] sm:$0xf]  ;;  %v1402_v19 = vld [vmem:[%s1679_s22 + $0x84] sm:$0xf0]  ;;  %v1194_v21 = vld [vmem:[%s1679_s22 + $0x8] sm:$0xf0]  ;;  %v1193_v24 = vor.u32 %v1386_v17, %v1192_v16 }
  0x14   : > { %v1401_v22 = vld [vmem:[%s1679_s22 + $0x84] sm:$0xf]  ;;  %v1258_v23 = vld [vmem:[%s1679_s22 + $0x88] sm:$0xf0]  ;;  %v1257_v25 = vor.u32 %v1402_v19, %v1256_v18  ;;  %v1197_v26 = vor.u32 %v1385_v20, %v1194_v21  ;;  %v1264_v30 = vld [vmem:[%s1679_s22 + $0x90] sm:$0xf] }
  0x15   : > { %657 = vmatpush.bf16.msra.mxu0 %v1422_v4  ;;  %1530 = vmatpush.bf16.msra.mxu2 %v1422_v4  ;;  %v1261_v27 = vor.u32 %v1401_v22, %v1258_v23  ;;  %v1404_v31 = vld [vmem:[%s1679_s22 + $0x94] sm:$0xf0]  ;;  %v1387_v32 = vld [vmem:[%s1679_s22 + $0x14] sm:$0xf]  ;;  %v1202_v33 = vld [vmem:[%s1679_s22 + $0x18] sm:$0xf0] }
  0x16   : > { %746 = vmatpush.bf16.msra.mxu1 %v1430_v5  ;;  %1538 = vmatpush.bf16.msra.mxu3 %v1430_v5  ;;  %v1403_v34 = vld [vmem:[%s1679_s22 + $0x94] sm:$0xf]  ;;  %v1266_v35 = vld [vmem:[%s1679_s22 + $0x98] sm:$0xf0]  ;;  %v1265_v37 = vor.u32 %v1404_v31, %v1264_v30  ;;  %v1205_v38 = vor.u32 %v1387_v32, %v1202_v33  ;;  %v1208_v40 = vld [vmem:[%s1679_s22 + $0x20] sm:$0xf] }
  0x17   : > { %v1269_v39 = vor.u32 %v1403_v34, %v1266_v35  ;;  %v1390_v41 = vld [vmem:[%s1679_s22 + $0x24] sm:$0xf0]  ;;  %v1272_v42 = vld [vmem:[%s1679_s22 + $0xa0] sm:$0xf]  ;;  %v1389_v44 = vld [vmem:[%s1679_s22 + $0x24] sm:$0xf] }
  0x18   : > { %v1406_v43 = vld [vmem:[%s1679_s22 + $0xa4] sm:$0xf0]  ;;  %v1210_v45 = vld [vmem:[%s1679_s22 + $0x28] sm:$0xf0]  ;;  %v1405_v46 = vld [vmem:[%s1679_s22 + $0xa4] sm:$0xf]  ;;  %v1209_v48 = vor.u32 %v1390_v41, %v1208_v40 }
  0x19   : > { %658 = vmatpush.bf16.msra.mxu0 %v1421_v6  ;;  %1531 = vmatpush.bf16.msra.mxu2 %v1421_v6  ;;  %v1274_v47 = vld [vmem:[%s1679_s22 + $0xa8] sm:$0xf0]  ;;  %v1273_v49 = vor.u32 %v1406_v43, %v1272_v42  ;;  %v1213_v50 = vor.u32 %v1389_v44, %v1210_v45  ;;  %v1216_v52 = vld [vmem:[%s1679_s22 + $0x30] sm:$0xf]  ;;  %v1392_v53 = vld [vmem:[%s1679_s22 + $0x34] sm:$0xf0] }
  0x1a   : > { %747 = vmatpush.bf16.msra.mxu1 %v1429_v7  ;;  %1539 = vmatpush.bf16.msra.mxu3 %v1429_v7  ;;  %v1277_v51 = vor.u32 %v1405_v46, %v1274_v47  ;;  %v1280_v54 = vld [vmem:[%s1679_s22 + $0xb0] sm:$0xf]  ;;  %v1408_v55 = vld [vmem:[%s1679_s22 + $0xb4] sm:$0xf0]  ;;  %v1391_v56 = vld [vmem:[%s1679_s22 + $0x34] sm:$0xf]  ;;  %v1217_v60 = vor.u32 %v1392_v53, %v1216_v52 }
  0x1b   : > { %v1218_v57 = vld [vmem:[%s1679_s22 + $0x38] sm:$0xf0]  ;;  %v1407_v58 = vld [vmem:[%s1679_s22 + $0xb4] sm:$0xf]  ;;  %v1281_v61 = vor.u32 %v1408_v55, %v1280_v54  ;;  %v1224_v0 = vld [vmem:[%s1679_s22 + $0x40] sm:$0xf] }
  0x1c   : > { %v1282_v59 = vld [vmem:[%s1679_s22 + $0xb8] sm:$0xf0]  ;;  %v1221_v62 = vor.u32 %v1391_v56, %v1218_v57  ;;  %v1394_v1 = vld [vmem:[%s1679_s22 + $0x44] sm:$0xf0]  ;;  %v1288_v2 = vld [vmem:[%s1679_s22 + $0xc0] sm:$0xf] }
  0x1d   : > { %659 = vmatpush.bf16.msra.mxu0 %v1420_v8  ;;  %1532 = vmatpush.bf16.msra.mxu2 %v1420_v8  ;;  %v1285_v63 = vor.u32 %v1407_v58, %v1282_v59  ;;  %v1410_v3 = vld [vmem:[%s1679_s22 + $0xc4] sm:$0xf0]  ;;  %v1393_v4 = vld [vmem:[%s1679_s22 + $0x44] sm:$0xf]  ;;  %v1226_v5 = vld [vmem:[%s1679_s22 + $0x48] sm:$0xf0]  ;;  %v1225_v8 = vor.u32 %v1394_v1, %v1224_v0 }
  0x1e   : > { %748 = vmatpush.bf16.msra.mxu1 %v1428_v9  ;;  %1540 = vmatpush.bf16.msra.mxu3 %v1428_v9  ;;  %v1409_v6 = vld [vmem:[%s1679_s22 + $0xc4] sm:$0xf]  ;;  %v1290_v7 = vld [vmem:[%s1679_s22 + $0xc8] sm:$0xf0]  ;;  %v1289_v9 = vor.u32 %v1410_v3, %v1288_v2  ;;  %v1395_v16 = vld [vmem:[%s1679_s22 + $0x54] sm:$0xf] }
  0x1f   : > { %v1234_v17 = vld [vmem:[%s1679_s22 + $0x58] sm:$0xf0]  ;;  %v1411_v18 = vld [vmem:[%s1679_s22 + $0xd4] sm:$0xf]  ;;  %v1397_v28 = vld [vmem:[%s1679_s22 + $0x64] sm:$0xf] }
  0x20   : > { %v1298_v19 = vld [vmem:[%s1679_s22 + $0xd8] sm:$0xf0]  ;;  %v1237_v22 = vor.u32 %v1395_v16, %v1234_v17  ;;  %v1242_v29 = vld [vmem:[%s1679_s22 + $0x68] sm:$0xf0]  ;;  %v1413_v30 = vld [vmem:[%s1679_s22 + $0xe4] sm:$0xf] }
  0x21   : > { %660 = vmatpush.bf16.msra.mxu0 %v1419_v10  ;;  %1533 = vmatpush.bf16.msra.mxu2 %v1419_v10  ;;  %v1229_v10 = vor.u32 %v1393_v4, %v1226_v5  ;;  %v1301_v23 = vor.u32 %v1411_v18, %v1298_v19  ;;  %v1306_v31 = vld [vmem:[%s1679_s22 + $0xe8] sm:$0xf0]  ;;  %v1245_v34 = vor.u32 %v1397_v28, %v1242_v29  ;;  %v1399_v40 = vld [vmem:[%s1679_s22 + $0x74] sm:$0xf]  ;;  %v1250_v41 = vld [vmem:[%s1679_s22 + $0x78] sm:$0xf0] }
  0x22   : > { %749 = vmatpush.bf16.msra.mxu1 %v1427_v11  ;;  %1541 = vmatpush.bf16.msra.mxu3 %v1427_v11  ;;  %v1293_v11 = vor.u32 %v1409_v6, %v1290_v7  ;;  %v1309_v35 = vor.u32 %v1413_v30, %v1306_v31  ;;  %v1415_v42 = vld [vmem:[%s1679_s22 + $0xf4] sm:$0xf]  ;;  %v1314_v43 = vld [vmem:[%s1679_s22 + $0xf8] sm:$0xf0]  ;;  %v1253_v46 = vor.u32 %v1399_v40, %v1250_v41 }
  0x23   : > { %v1317_v47 = vor.u32 %v1415_v42, %v1314_v43 }
  0x25   : > { %661 = vmatpush.bf16.msra.mxu0 %v1418_v12  ;;  %1534 = vmatpush.bf16.msra.mxu2 %v1418_v12  ;;  %v1232_v12 = vld [vmem:[%s1679_s22 + $0x50] sm:$0xf] }
  0x26   : > { %750 = vmatpush.bf16.msra.mxu1 %v1426_v13  ;;  %1542 = vmatpush.bf16.msra.mxu3 %v1426_v13  ;;  %v1396_v13 = vld [vmem:[%s1679_s22 + $0x54] sm:$0xf0] }
  0x27   : > { %v1233_v20 = vor.u32 %v1396_v13, %v1232_v12 }
  0x29   : > { %662 = vmatpush.bf16.msra.mxu0 %v1417_v14  ;;  %1535 = vmatpush.bf16.msra.mxu2 %v1417_v14  ;;  %v1296_v14 = vld [vmem:[%s1679_s22 + $0xd0] sm:$0xf] }
  0x2a   : > { %751 = vmatpush.bf16.msra.mxu1 %v1425_v15  ;;  %1543 = vmatpush.bf16.msra.mxu3 %v1425_v15  ;;  %v1412_v15 = vld [vmem:[%s1679_s22 + $0xd4] sm:$0xf0] }
  0x2b   : > { %v1297_v21 = vor.u32 %v1412_v15, %v1296_v14 }
  0x2c   : > { %663 = vmatmul.bf16.vlgmr.msra.gmra.mxu0 %v1193_v24  ;;  %703 = vmatmul.bf16.vlgmr.msra.gmra.mxu2 %v1257_v25  ;;  %v1240_v24 = vld [vmem:[%s1679_s22 + $0x60] sm:$0xf]  ;;  %v1398_v25 = vld [vmem:[%s1679_s22 + $0x64] sm:$0xf0] }
  0x2d   : > { %752 = vmatmul.bf16.vlgmr.msra.gmra.mxu1 %v1197_v26  ;;  %792 = vmatmul.bf16.vlgmr.msra.gmra.mxu3 %v1261_v27  ;;  %v1304_v26 = vld [vmem:[%s1679_s22 + $0xe0] sm:$0xf]  ;;  %v1414_v27 = vld [vmem:[%s1679_s22 + $0xe4] sm:$0xf0]  ;;  %v1241_v32 = vor.u32 %v1398_v25, %v1240_v24 }
  0x2e   : > { %v1305_v33 = vor.u32 %v1414_v27, %v1304_v26 }
  0x3c   : > { %668 = vmatmul.bf16.gmra.mxu0 %v1201_v36  ;;  %708 = vmatmul.bf16.gmra.mxu2 %v1265_v37  ;;  %v1248_v36 = vld [vmem:[%s1679_s22 + $0x70] sm:$0xf]  ;;  %v1400_v37 = vld [vmem:[%s1679_s22 + $0x74] sm:$0xf0] }
  0x3d   : > { %757 = vmatmul.bf16.gmra.mxu1 %v1205_v38  ;;  %797 = vmatmul.bf16.gmra.mxu3 %v1269_v39  ;;  %v1312_v38 = vld [vmem:[%s1679_s22 + $0xf0] sm:$0xf]  ;;  %v1416_v39 = vld [vmem:[%s1679_s22 + $0xf4] sm:$0xf0]  ;;  %v1249_v44 = vor.u32 %v1400_v37, %v1248_v36 }
  0x3e   : > { %v1313_v45 = vor.u32 %v1416_v39, %v1312_v38 }
  0x4c   : > { %673 = vmatmul.bf16.gmra.mxu0 %v1209_v48  ;;  %713 = vmatmul.bf16.gmra.mxu2 %v1273_v49 }
  0x4d   : > { %762 = vmatmul.bf16.gmra.mxu1 %v1213_v50  ;;  %802 = vmatmul.bf16.gmra.mxu3 %v1277_v51  ;;  %v1757_v51 = vld [vmem:[%s1824_s2] ss:$0 sm:$0xff] }
  0x5c   : > { %678 = vmatmul.bf16.gmra.mxu0 %v1217_v60  ;;  %718 = vmatmul.bf16.gmra.mxu2 %v1281_v61 }
  0x5d   : > { %767 = vmatmul.bf16.gmra.mxu1 %v1221_v62  ;;  %807 = vmatmul.bf16.gmra.mxu3 %v1285_v63 }
  0x6c   : > { %683 = vmatmul.bf16.gmra.mxu0 %v1225_v8  ;;  %723 = vmatmul.bf16.gmra.mxu2 %v1289_v9 }
  0x6d   : > { %772 = vmatmul.bf16.gmra.mxu1 %v1229_v10  ;;  %812 = vmatmul.bf16.gmra.mxu3 %v1293_v11 }
  0x7c   : > { %688 = vmatmul.bf16.gmra.mxu0 %v1233_v20  ;;  %728 = vmatmul.bf16.gmra.mxu2 %v1297_v21 }
  0x7d   : > { %777 = vmatmul.bf16.gmra.mxu1 %v1237_v22  ;;  %817 = vmatmul.bf16.gmra.mxu3 %v1301_v23 }
  0x8c   : > { %693 = vmatmul.bf16.gmra.mxu0 %v1241_v32  ;;  %733 = vmatmul.bf16.gmra.mxu2 %v1305_v33 }
  0x8d   : > { %782 = vmatmul.bf16.gmra.mxu1 %v1245_v34  ;;  %822 = vmatmul.bf16.gmra.mxu3 %v1309_v35 }
  0x9c   : > { %698 = vmatmul.bf16.gmra.mxu0 %v1249_v44  ;;  %738 = vmatmul.bf16.gmra.mxu2 %v1313_v45 }
  0x9d   : > { %787 = vmatmul.bf16.gmra.mxu1 %v1253_v46  ;;  %827 = vmatmul.bf16.gmra.mxu3 %v1317_v47 }
  0xa9   : > { %v664_v48 = vpop.f32.mrf.mxu0 }
  0xaa   : > { %v753_v49 = vpop.f32.mrf.mxu1 }
  0xab   : > { %v754_v50 = vadd.f32 %v753_v49, %v664_v48 }
  0xad   : > { %v936_v56 = vadd.f32 %v1757_v51, %v754_v50 }
  0xaf   : > { %v704_v52 = vpop.f32.mrf.mxu2  ;;  %v968_v60 = vmax.f32 %v936_v56, 0.0 }
  0xb0   : > { %v793_v53 = vpop.f32.mrf.mxu3 }
  0xb1   : > { %v666_v54 = vpop.f32.mrf.mxu0  ;;  %v794_v58 = vadd.f32 %v793_v53, %v704_v52 }
  0xb2   : > { %v755_v55 = vpop.f32.mrf.mxu1 }
  0xb3   : > { %v756_v57 = vadd.f32 %v755_v55, %v666_v54  ;;  %v952_v0 = vadd.f32 %v1757_v51, %v794_v58 }
  0xb5   : > { %v937_v59 = vadd.f32 %v1757_v51, %v756_v57  ;;  %v984_v6 = vmax.f32 %v952_v0, 0.0 }
  0xb7   : > { %v969_v61 = vmax.f32 %v937_v59, 0.0  ;;  %v706_v62 = vpop.f32.mrf.mxu2 }
  0xb8   : > { %v795_v63 = vpop.f32.mrf.mxu3 }
  0xb9   : > { %v1436_v1 = vpack.c.bf16 %v969_v61, %v968_v60  ;;  %v796_v2 = vadd.f32 %v795_v63, %v706_v62  ;;  %v669_v3 = vpop.f32.mrf.mxu0 }
  0xba   : > { %v758_v4 = vpop.f32.mrf.mxu1 }
  0xbb   : > { %1437 = vst [vmem:[%s1765_s8] sm:$0xff] %v1436_v1   ;;  %v953_v5 = vadd.f32 %v1757_v51, %v796_v2  ;;  %v759_v9 = vadd.f32 %v758_v4, %v669_v3 }
  0xbd   : > { %v985_v7 = vmax.f32 %v953_v5, 0.0  ;;  %v938_v14 = vadd.f32 %v1757_v51, %v759_v9 }
  0xbf   : > { %v1476_v8 = vpack.c.bf16 %v985_v7, %v984_v6  ;;  %v709_v10 = vpop.f32.mrf.mxu2  ;;  %v970_v18 = vmax.f32 %v938_v14, 0.0 }
  0xc0   : > { %v798_v11 = vpop.f32.mrf.mxu3 }
  0xc1   : > { %1520 = vst [vmem:[%s1765_s8 + $0x40] sm:$0xff] %v1476_v8   ;;  %v671_v12 = vpop.f32.mrf.mxu0  ;;  %v799_v16 = vadd.f32 %v798_v11, %v709_v10 }
  0xc2   : > { %v760_v13 = vpop.f32.mrf.mxu1 }
  0xc3   : > { %v761_v15 = vadd.f32 %v760_v13, %v671_v12  ;;  %v954_v22 = vadd.f32 %v1757_v51, %v799_v16 }
  0xc5   : > { %v939_v17 = vadd.f32 %v1757_v51, %v761_v15  ;;  %v986_v28 = vmax.f32 %v954_v22, 0.0 }
  0xc7   : > { %v971_v19 = vmax.f32 %v939_v17, 0.0  ;;  %v711_v20 = vpop.f32.mrf.mxu2 }
  0xc8   : > { %v800_v21 = vpop.f32.mrf.mxu3 }
  0xc9   : > { %v1441_v23 = vpack.c.bf16 %v971_v19, %v970_v18  ;;  %v801_v24 = vadd.f32 %v800_v21, %v711_v20  ;;  %v674_v25 = vpop.f32.mrf.mxu0 }
  0xca   : > { %v763_v26 = vpop.f32.mrf.mxu1 }
  0xcb   : > { %1513 = vst [vmem:[%s1765_s8 + $0x8] sm:$0xff] %v1441_v23   ;;  %v955_v27 = vadd.f32 %v1757_v51, %v801_v24  ;;  %v764_v31 = vadd.f32 %v763_v26, %v674_v25 }
  0xcd   : > { %v987_v29 = vmax.f32 %v955_v27, 0.0  ;;  %v940_v36 = vadd.f32 %v1757_v51, %v764_v31 }
  0xcf   : > { %v1481_v30 = vpack.c.bf16 %v987_v29, %v986_v28  ;;  %v714_v32 = vpop.f32.mrf.mxu2  ;;  %v972_v40 = vmax.f32 %v940_v36, 0.0 }
  0xd0   : > { %v803_v33 = vpop.f32.mrf.mxu3 }
  0xd1   : > { %1521 = vst [vmem:[%s1765_s8 + $0x48] sm:$0xff] %v1481_v30   ;;  %v676_v34 = vpop.f32.mrf.mxu0  ;;  %v804_v38 = vadd.f32 %v803_v33, %v714_v32 }
  0xd2   : > { %v765_v35 = vpop.f32.mrf.mxu1 }
  0xd3   : > { %v766_v37 = vadd.f32 %v765_v35, %v676_v34  ;;  %v956_v44 = vadd.f32 %v1757_v51, %v804_v38 }
  0xd5   : > { %v941_v39 = vadd.f32 %v1757_v51, %v766_v37  ;;  %v988_v50 = vmax.f32 %v956_v44, 0.0 }
  0xd7   : > { %v973_v41 = vmax.f32 %v941_v39, 0.0  ;;  %v716_v42 = vpop.f32.mrf.mxu2 }
  0xd8   : > { %v805_v43 = vpop.f32.mrf.mxu3 }
  0xd9   : > { %v1446_v45 = vpack.c.bf16 %v973_v41, %v972_v40  ;;  %v806_v46 = vadd.f32 %v805_v43, %v716_v42  ;;  %v679_v47 = vpop.f32.mrf.mxu0 }
  0xda   : > { %v768_v48 = vpop.f32.mrf.mxu1 }
  0xdb   : > { %1514 = vst [vmem:[%s1765_s8 + $0x10] sm:$0xff] %v1446_v45   ;;  %v957_v49 = vadd.f32 %v1757_v51, %v806_v46  ;;  %v769_v54 = vadd.f32 %v768_v48, %v679_v47 }
  0xdd   : > { %v989_v52 = vmax.f32 %v957_v49, 0.0  ;;  %v942_v59 = vadd.f32 %v1757_v51, %v769_v54 }
  0xdf   : > { %v1486_v53 = vpack.c.bf16 %v989_v52, %v988_v50  ;;  %v719_v55 = vpop.f32.mrf.mxu2  ;;  %v974_v63 = vmax.f32 %v942_v59, 0.0 }
  0xe0   : > { %v808_v56 = vpop.f32.mrf.mxu3 }
  0xe1   : > { %1522 = vst [vmem:[%s1765_s8 + $0x50] sm:$0xff] %v1486_v53   ;;  %v681_v57 = vpop.f32.mrf.mxu0  ;;  %v809_v61 = vadd.f32 %v808_v56, %v719_v55 }
  0xe2   : > { %v770_v58 = vpop.f32.mrf.mxu1 }
  0xe3   : > { %v771_v60 = vadd.f32 %v770_v58, %v681_v57  ;;  %v958_v3 = vadd.f32 %v1757_v51, %v809_v61 }
  0xe5   : > { %v943_v62 = vadd.f32 %v1757_v51, %v771_v60  ;;  %v990_v9 = vmax.f32 %v958_v3, 0.0 }
  0xe7   : > { %v975_v0 = vmax.f32 %v943_v62, 0.0  ;;  %v721_v1 = vpop.f32.mrf.mxu2 }
  0xe8   : > { %v810_v2 = vpop.f32.mrf.mxu3 }
  0xe9   : > { %v1451_v4 = vpack.c.bf16 %v975_v0, %v974_v63  ;;  %v811_v5 = vadd.f32 %v810_v2, %v721_v1  ;;  %v684_v6 = vpop.f32.mrf.mxu0 }
  0xea   : > { %v773_v7 = vpop.f32.mrf.mxu1 }
  0xeb   : > { %1515 = vst [vmem:[%s1765_s8 + $0x18] sm:$0xff] %v1451_v4   ;;  %v959_v8 = vadd.f32 %v1757_v51, %v811_v5  ;;  %v774_v12 = vadd.f32 %v773_v7, %v684_v6 }
  0xed   : > { %v991_v10 = vmax.f32 %v959_v8, 0.0  ;;  %v944_v17 = vadd.f32 %v1757_v51, %v774_v12 }
  0xef   : > { %v1491_v11 = vpack.c.bf16 %v991_v10, %v990_v9  ;;  %v724_v13 = vpop.f32.mrf.mxu2  ;;  %v976_v21 = vmax.f32 %v944_v17, 0.0 }
  0xf0   : > { %v813_v14 = vpop.f32.mrf.mxu3 }
  0xf1   : > { %1523 = vst [vmem:[%s1765_s8 + $0x58] sm:$0xff] %v1491_v11   ;;  %v686_v15 = vpop.f32.mrf.mxu0  ;;  %v814_v19 = vadd.f32 %v813_v14, %v724_v13 }
  0xf2   : > { %v775_v16 = vpop.f32.mrf.mxu1 }
  0xf3   : > { %v776_v18 = vadd.f32 %v775_v16, %v686_v15  ;;  %v960_v25 = vadd.f32 %v1757_v51, %v814_v19 }
  0xf5   : > { %v945_v20 = vadd.f32 %v1757_v51, %v776_v18  ;;  %v992_v31 = vmax.f32 %v960_v25, 0.0 }
  0xf7   : > { %v977_v22 = vmax.f32 %v945_v20, 0.0  ;;  %v726_v23 = vpop.f32.mrf.mxu2 }
  0xf8   : > { %v815_v24 = vpop.f32.mrf.mxu3 }
  0xf9   : > { %v1456_v26 = vpack.c.bf16 %v977_v22, %v976_v21  ;;  %v816_v27 = vadd.f32 %v815_v24, %v726_v23  ;;  %v689_v28 = vpop.f32.mrf.mxu0 }
  0xfa   : > { %v778_v29 = vpop.f32.mrf.mxu1 }
  0xfb   : > { %1516 = vst [vmem:[%s1765_s8 + $0x20] sm:$0xff] %v1456_v26   ;;  %v961_v30 = vadd.f32 %v1757_v51, %v816_v27  ;;  %v779_v34 = vadd.f32 %v778_v29, %v689_v28 }
  0xfd   : > { %v993_v32 = vmax.f32 %v961_v30, 0.0  ;;  %v946_v39 = vadd.f32 %v1757_v51, %v779_v34 }
  0xff   : > { %v1496_v33 = vpack.c.bf16 %v993_v32, %v992_v31  ;;  %v729_v35 = vpop.f32.mrf.mxu2  ;;  %v978_v43 = vmax.f32 %v946_v39, 0.0 }
 0x100   : > { %v818_v36 = vpop.f32.mrf.mxu3 }
 0x101   : > { %1524 = vst [vmem:[%s1765_s8 + $0x60] sm:$0xff] %v1496_v33   ;;  %v691_v37 = vpop.f32.mrf.mxu0  ;;  %v819_v41 = vadd.f32 %v818_v36, %v729_v35 }
 0x102   : > { %v780_v38 = vpop.f32.mrf.mxu1 }
 0x103   : > { %v781_v40 = vadd.f32 %v780_v38, %v691_v37  ;;  %v962_v47 = vadd.f32 %v1757_v51, %v819_v41 }
 0x105   : > { %v947_v42 = vadd.f32 %v1757_v51, %v781_v40  ;;  %v994_v54 = vmax.f32 %v962_v47, 0.0 }
 0x107   : > { %v979_v44 = vmax.f32 %v947_v42, 0.0  ;;  %v731_v45 = vpop.f32.mrf.mxu2 }
 0x108   : > { %v820_v46 = vpop.f32.mrf.mxu3 }
 0x109   : > { %v1461_v48 = vpack.c.bf16 %v979_v44, %v978_v43  ;;  %v821_v49 = vadd.f32 %v820_v46, %v731_v45  ;;  %v694_v50 = vpop.f32.mrf.mxu0 }
 0x10a   : > { %v783_v52 = vpop.f32.mrf.mxu1 }
 0x10b   : > { %1517 = vst [vmem:[%s1765_s8 + $0x28] sm:$0xff] %v1461_v48   ;;  %v963_v53 = vadd.f32 %v1757_v51, %v821_v49  ;;  %v784_v57 = vadd.f32 %v783_v52, %v694_v50 }
 0x10d   : > { %v995_v55 = vmax.f32 %v963_v53, 0.0  ;;  %v948_v62 = vadd.f32 %v1757_v51, %v784_v57 }
 0x10f   : > { %v1501_v56 = vpack.c.bf16 %v995_v55, %v994_v54  ;;  %v734_v58 = vpop.f32.mrf.mxu2  ;;  %v980_v2 = vmax.f32 %v948_v62, 0.0 }
 0x110   : > { %v823_v59 = vpop.f32.mrf.mxu3 }
 0x111   : > { %1525 = vst [vmem:[%s1765_s8 + $0x68] sm:$0xff] %v1501_v56   ;;  %v696_v60 = vpop.f32.mrf.mxu0  ;;  %v824_v0 = vadd.f32 %v823_v59, %v734_v58 }
 0x112   : > { %v785_v61 = vpop.f32.mrf.mxu1 }
 0x113   : > { %v786_v63 = vadd.f32 %v785_v61, %v696_v60  ;;  %v964_v6 = vadd.f32 %v1757_v51, %v824_v0 }
 0x115   : > { %v949_v1 = vadd.f32 %v1757_v51, %v786_v63  ;;  %v996_v12 = vmax.f32 %v964_v6, 0.0 }
 0x117   : > { %v981_v3 = vmax.f32 %v949_v1, 0.0  ;;  %v736_v4 = vpop.f32.mrf.mxu2 }
 0x118   : > { %v825_v5 = vpop.f32.mrf.mxu3 }
 0x119   : > { %v1466_v7 = vpack.c.bf16 %v981_v3, %v980_v2  ;;  %v826_v8 = vadd.f32 %v825_v5, %v736_v4  ;;  %v699_v9 = vpop.f32.mrf.mxu0 }
 0x11a   : > { %v788_v10 = vpop.f32.mrf.mxu1 }
 0x11b   : > { %1518 = vst [vmem:[%s1765_s8 + $0x30] sm:$0xff] %v1466_v7   ;;  %v965_v11 = vadd.f32 %v1757_v51, %v826_v8  ;;  %v789_v15 = vadd.f32 %v788_v10, %v699_v9 }
 0x11d   : > { %v997_v13 = vmax.f32 %v965_v11, 0.0  ;;  %v950_v20 = vadd.f32 %v1757_v51, %v789_v15 }
 0x11f   : > { %v1506_v14 = vpack.c.bf16 %v997_v13, %v996_v12  ;;  %v739_v16 = vpop.f32.mrf.mxu2  ;;  %v982_v24 = vmax.f32 %v950_v20, 0.0 }
 0x120   : > { %v828_v17 = vpop.f32.mrf.mxu3 }
 0x121   : > { %1526 = vst [vmem:[%s1765_s8 + $0x70] sm:$0xff] %v1506_v14   ;;  %v701_v18 = vpop.f32.mrf.mxu0  ;;  %v829_v22 = vadd.f32 %v828_v17, %v739_v16 }
 0x122   : > { %v790_v19 = vpop.f32.mrf.mxu1 }
 0x123   : > { %v791_v21 = vadd.f32 %v790_v19, %v701_v18  ;;  %v966_v28 = vadd.f32 %v1757_v51, %v829_v22 }
 0x125   : > { %v951_v23 = vadd.f32 %v1757_v51, %v791_v21  ;;  %v998_v32 = vmax.f32 %v966_v28, 0.0 }
 0x127   : > { %v983_v25 = vmax.f32 %v951_v23, 0.0  ;;  %v741_v26 = vpop.f32.mrf.mxu2 }
 0x128   : > { %v830_v27 = vpop.f32.mrf.mxu3 }
 0x129   : > { %v1471_v29 = vpack.c.bf16 %v983_v25, %v982_v24  ;;  %v831_v30 = vadd.f32 %v830_v27, %v741_v26 }
 0x12b   : > { %1519 = vst [vmem:[%s1765_s8 + $0x38] sm:$0xff] %v1471_v29   ;;  %v967_v31 = vadd.f32 %v1757_v51, %v831_v30 }
 0x12d   : > { %v999_v33 = vmax.f32 %v967_v31, 0.0 }
 0x12f   : > { %v1511_v34 = vpack.c.bf16 %v999_v33, %v998_v32 }
 0x131   : > { %1527 = vst [vmem:[%s1765_s8 + $0x78] sm:$0xff] %v1511_v34  }
 0x132 PF: > { %s13_s14 = sadd.s32 1, %s1591_s14   ;;  %s1826_s12 = smov %s1587_s13 }
 0x133   : > { %p10_p5 = scmp.ge.s32.totalorder %s13_s14, 4   ;;  %s1827_s13 = smov %s1829_s15 }
 0x135   :  { %12 = sbr.rel (!%p10_p5) target bundleno = 2 (0x2), region = 76 }

</bundles_post_ra>
